<compile_context>
chip_gen: v7x
topology: tpu7x:2x2x1
jax: 0.10.0
libtpu: 0.0.40
codegen_flags: <defaults>
</compile_context>

<pallas_src>
import functools

import jax
import jax.numpy as jnp
import numpy as np
from jax.experimental import pallas as pl
from jax.experimental.pallas import tpu as pltpu


def _round_up(x, m):
    return ((x + m - 1) // m) * m


def _noobj_prior_kernel(tgt_ref, aidx_ref, feat_ref, meta_ref, out_ref, *,
                        bb, T, G, N_b, tile, iou_thresh):
    """One grid step: bb images x one box tile -> (8, 128) lane partial sums.

    tgt_ref  : SMEM (batch*T*5,) f32   per-target x1, y1, x2, y2, thr*area
    aidx_ref : SMEM (batch*T,)   i32   assigned flat box index (-1 if none)
    feat_ref : VMEM (bb*5, TR, 128)    tx, ty, tw, th, conf raw head outputs
    meta_ref : VMEM (4,   TR, 128)     i, j, anchor_w/G, anchor_h/G
    out_ref  : VMEM (8, 128)           row 0 = noobj partial, row 1 = prior
    """
    TR = feat_ref.shape[1]
    s = pl.program_id(0)
    t_idx = pl.program_id(1)
    inv_g = 1.0 / G
    thr = iou_thresh
    k1 = 1.0 + thr

    # ---- loop-invariant tiles, hoisted out of the per-image loop ----
    i_off = meta_ref[0]
    j_off = meta_ref[1]
    awg = meta_ref[2]
    ahg = meta_ref[3]
    row = jax.lax.broadcasted_iota(jnp.int32, (TR, 128), 0)
    lane = jax.lax.broadcasted_iota(jnp.int32, (TR, 128), 1)
    box_idx = t_idx * tile + row * 128 + lane          # global box id per lane
    valid = (box_idx < N_b).astype(jnp.float32)        # mask out padded boxes

    def body(bi, carry):
        ln, lp = carry                                  # (TR, 128) accumulators
        b = s * bb + bi
        fo = bi * 5

        # activations & box decode (f32 compute even if HBM stream is bf16)
        tx = jax.nn.sigmoid(feat_ref[fo + 0].astype(jnp.float32))
        ty = jax.nn.sigmoid(feat_ref[fo + 1].astype(jnp.float32))
        tw = feat_ref[fo + 2].astype(jnp.float32)
        th = feat_ref[fo + 3].astype(jnp.float32)
        conf = jax.nn.sigmoid(feat_ref[fo + 4].astype(jnp.float32))

        bx = (tx + i_off) * inv_g
        by = (ty + j_off) * inv_g
        bw = jnp.exp(tw) * awg                          # anchors already / G
        bh = jnp.exp(th) * ahg
        bx1 = bx - 0.5 * bw
        bx2 = bx + 0.5 * bw
        by1 = by - 0.5 * bh
        by2 = by + 0.5 * bh
        thr_ap = thr * (bw * bh)

        # (a) no-object decision, division free:
        #     max_t IoU <= thr <=> max_t [inter*(1+thr) - thr*area_p - thr*area_t] <= 0
        # TODO(synk): assumes union > 0 (true for exp-decoded predicted boxes).
        # (b) object-box exclusion via the <=T assigned indices (SMEM scalars).
        score = jnp.full((TR, 128), -1.0, jnp.float32)
        obj = jnp.zeros((TR, 128), jnp.float32)
        for t in range(T):                              # T static & small
            o = (b * T + t) * 5
            x1 = tgt_ref[o + 0]
            y1 = tgt_ref[o + 1]
            x2 = tgt_ref[o + 2]
            y2 = tgt_ref[o + 3]
            ta = tgt_ref[o + 4]                         # thr * target area
            iw = jnp.maximum(jnp.minimum(bx2, x2) - jnp.maximum(bx1, x1), 0.0)
            ih = jnp.maximum(jnp.minimum(by2, y2) - jnp.maximum(by1, y1), 0.0)
            score = jnp.maximum(score, iw * ih * k1 - thr_ap - ta)
            obj = jnp.where(box_idx == aidx_ref[b * T + t], 1.0, obj)
        below = jnp.where(score <= 0.0, 1.0, 0.0)
        nonobj = valid * (1.0 - obj)

        ln = ln + nonobj * below * conf * conf
        p0 = tx - 0.5
        p1 = ty - 0.5
        lp = lp + nonobj * (p0 * p0 + p1 * p1 + tw * tw + th * th)
        return ln, lp

    zero = jnp.zeros((TR, 128), jnp.float32)
    ln, lp = jax.lax.fori_loop(0, bb, body, (zero, zero))

    # single cross-sublane reduction per loss term; direct lane-dense stores
    out_ref[0:1, :] = jnp.sum(ln, axis=0, keepdims=True)
    out_ref[1:2, :] = jnp.sum(lp, axis=0, keepdims=True)
    out_ref[2:8, :] = jnp.zeros((6, 128), jnp.float32)


def yolov2_loss(preds, targets, anchors, *, B=5, C=20,
                object_scale=5.0, noobject_scale=1.0, class_scale=1.0,
                coord_scale=1.0, prior_coord_scale=0.01, iou_thresh=0.6,
                seen=0):
    batch, ch, G, G2 = preds.shape
    assert G == G2 and ch == B * (C + 5)
    T = targets.shape[1]
    F = C + 5
    anchors = jnp.asarray(anchors, jnp.float32).reshape(-1, 2)

    # ---- box-axis tiling: n = (j*G + i)*B + a, padded to lane-dense planes ----
    N_b = G * G * B
    N_bp = _round_up(N_b, 1024)
    tile = min(N_bp, 8192)
    while N_bp % tile:
        tile -= 1024
    n_tiles = N_bp // tile
    TR = tile // 128
    R = N_bp // 128

    # images per grid step: ~32k boxes/step to amortize pipeline overhead, but
    # keep the grid at >= 2 steps (v7x megacore) and batch % bb == 0.
    bb = max(1, min(batch, 32768 // tile))
    if n_tiles == 1 and batch >= 2:
        bb = min(bb, batch // 2)
    while batch % bb:
        bb -= 1
    S = batch // bb

    # bf16 HBM stream on v6e/v7x when the bf16 (16,128) packing divides the
    # tile; f32 otherwise (v5e has no bf16 vector path).  Compute stays f32.
    kind = jax.devices()[0].device_kind.lower()
    feat_dtype = (jnp.bfloat16
                  if (('v6' in kind or 'v7' in kind) and TR % 16 == 0)
                  else jnp.float32)

    # ---- raw head outputs (b, a, f, j, i); only 5 planes go to the kernel ----
    op = preds.astype(jnp.float32).reshape(batch, B, F, G, G)
    feat5 = jnp.transpose(op[:, :, :5], (0, 2, 3, 4, 1)).reshape(batch, 5, N_b)
    feat5 = jnp.pad(feat5, ((0, 0), (0, 0), (0, N_bp - N_b)))
    feat5 = feat5.reshape(S, bb * 5, R, 128).astype(feat_dtype)

    # ---- per-box metadata (image independent): i, j, anchor_w/G, anchor_h/G ----
    i_off = jnp.broadcast_to(jnp.arange(G, dtype=jnp.float32)[None, :, None], (G, G, B)).reshape(-1)
    j_off = jnp.broadcast_to(jnp.arange(G, dtype=jnp.float32)[:, None, None], (G, G, B)).reshape(-1)
    aw_b = jnp.broadcast_to((anchors[:, 0] / G)[None, None, :], (G, G, B)).reshape(-1)
    ah_b = jnp.broadcast_to((anchors[:, 1] / G)[None, None, :], (G, G, B)).reshape(-1)
    meta = jnp.stack([i_off, j_off, aw_b, ah_b], axis=0)
    meta = jnp.pad(meta, ((0, 0), (0, N_bp - N_b))).reshape(4, R, 128)

    # ---- targets; x == 0 terminates the per-image list (torch `break`) ----
    cls_id = targets[..., 0].astype(jnp.int32)
    tbox = targets[..., 1:5].astype(jnp.float32)
    x, y, w, h = tbox[..., 0], tbox[..., 1], tbox[..., 2], tbox[..., 3]
    valid_i = jnp.cumprod((x != 0).astype(jnp.int32), axis=1)
    valid_f = valid_i.astype(jnp.float32)

    # small SMEM target table for the in-kernel noobj IoU test (all valid targets)
    xm, ym, wm, hm = x * valid_f, y * valid_f, w * valid_f, h * valid_f
    tgt_f = jnp.stack([xm - 0.5 * wm, ym - 0.5 * hm,
                       xm + 0.5 * wm, ym + 0.5 * hm,
                       iou_thresh * wm * hm], axis=-1).reshape(-1)   # (batch*T*5,)

    # ---- target assignment (scalar glue, at most batch*T rows) ----
    # TODO(synk): x == 1.0 / y == 1.0 gives gi == G / gj == G which errors in
    #             the PyTorch reference; we clamp to the last grid cell.
    gi = jnp.clip((x * G).astype(jnp.int32), 0, G - 1)
    gj = jnp.clip((y * G).astype(jnp.int32), 0, G - 1)
    ainter = jnp.minimum(w[..., None], anchors[:, 0] / G) * jnp.minimum(h[..., None], anchors[:, 1] / G)
    aunion = w[..., None] * h[..., None] + (anchors[:, 0] / G) * (anchors[:, 1] / G) - ainter
    a_idx = jnp.argmax(ainter / jnp.maximum(aunion, 1e-12), axis=-1).astype(jnp.int32)

    # "if obj_mask already set: continue" -> first valid target per box wins
    key = (gj * G + gi) * B + a_idx
    earlier = jnp.tril(jnp.ones((T, T), dtype=bool), k=-1)
    conflict = jnp.any((key[:, :, None] == key[:, None, :]) & earlier[None]
                       & (valid_i[:, None, :] > 0), axis=-1)
    applied = valid_f * (1.0 - conflict.astype(jnp.float32))
    assigned_idx = jnp.where(applied > 0, key, -1).astype(jnp.int32).reshape(-1)

    # ---- object / coordinate / class losses in JAX on the <=T assigned boxes ----
    b_ix = jnp.arange(batch, dtype=jnp.int32)[:, None]
    pv = op[b_ix, a_idx, :, gj, gi]                      # (batch, T, C+5) gather
    ptx = jax.nn.sigmoid(pv[..., 0])
    pty = jax.nn.sigmoid(pv[..., 1])
    ptw = pv[..., 2]
    pth = pv[..., 3]
    pconf = jax.nn.sigmoid(pv[..., 4])

    gif = gi.astype(jnp.float32)
    gjf = gj.astype(jnp.float32)
    px = (ptx + gif) / G
    py = (pty + gjf) / G
    pw = jnp.exp(ptw) * anchors[a_idx, 0] / G
    ph = jnp.exp(pth) * anchors[a_idx, 1] / G
    ix = jnp.maximum(jnp.minimum(px + 0.5 * pw, x + 0.5 * w)
                     - jnp.maximum(px - 0.5 * pw, x - 0.5 * w), 0.0)
    iy = jnp.maximum(jnp.minimum(py + 0.5 * ph, y + 0.5 * h)
                     - jnp.maximum(py - 0.5 * ph, y - 0.5 * h), 0.0)
    inter = ix * iy
    union = jnp.maximum(pw * ph + w * h - inter, 1e-12)
    obj_iou = inter / union
    loss_obj = jnp.sum(applied * (pconf - obj_iou) ** 2)

    ex = x * G - gif
    ey = y * G - gjf
    ew = jnp.log(jnp.where(applied > 0, w * G / anchors[a_idx, 0], 1.0))
    eh = jnp.log(jnp.where(applied > 0, h * G / anchors[a_idx, 1], 1.0))
    wh_scale = 2.0 - w * h
    cdiff = ((ptx - ex) ** 2 + (pty - ey) ** 2
             + (ptw - ew) ** 2 + (pth - eh) ** 2)
    loss_coords = jnp.sum(applied * wh_scale * wh_scale * cdiff)

    probs = jax.nn.softmax(pv[..., 5:], axis=-1)
    onehot = jax.nn.one_hot(cls_id, C, dtype=jnp.float32)
    loss_class = jnp.sum(applied[..., None] * (probs - onehot) ** 2)

    # ---- Pallas kernel: noobj + prior losses over every box ----
    kernel = functools.partial(_noobj_prior_kernel, bb=bb, T=T, G=G,
                               N_b=N_b, tile=tile, iou_thresh=float(iou_thresh))
    out = pl.pallas_call(
        kernel,
        grid=(S, n_tiles),
        in_specs=[
            pl.BlockSpec(memory_space=pltpu.MemorySpace.SMEM),   # target table
            pl.BlockSpec(memory_space=pltpu.MemorySpace.SMEM),   # assigned idx
            pl.BlockSpec((None, bb * 5, TR, 128), lambda s, t: (s, 0, t, 0)),
            pl.BlockSpec((4, TR, 128), lambda s, t: (0, t, 0)),
        ],
        out_specs=pl.BlockSpec((None, 8, 128), lambda s, t: (s, t, 0)),
        out_shape=jax.ShapeDtypeStruct((S, n_tiles * 8, 128), jnp.float32),
        compiler_params=pltpu.CompilerParams(
            dimension_semantics=("parallel", "parallel"),
            vmem_limit_bytes=32 * 1024 * 1024),
    )(tgt_f, assigned_idx, feat5, meta)

    parts = jnp.sum(out.reshape(S, n_tiles, 8, 128), axis=(0, 1, 3))
    loss_noobj = parts[0]
    loss_prior = parts[1] if seen < 12800 else 0.0

    loss = (class_scale * loss_class + object_scale * loss_obj
            + noobject_scale * loss_noobj + coord_scale * loss_coords
            + prior_coord_scale * loss_prior)
    return loss / batch


# ----------------------------- reference (NumPy) -----------------------------
def _np_bbox_iou(a, b):
    ax1, ax2 = a[:, 0] - a[:, 2] / 2, a[:, 0] + a[:, 2] / 2
    ay1, ay2 = a[:, 1] - a[:, 3] / 2, a[:, 1] + a[:, 3] / 2
    bx1, bx2 = b[:, 0] - b[:, 2] / 2, b[:, 0] + b[:, 2] / 2
    by1, by2 = b[:, 1] - b[:, 3] / 2, b[:, 1] + b[:, 3] / 2
    iw = np.maximum(np.minimum(ax2[:, None], bx2[None, :])
                    - np.maximum(ax1[:, None], bx1[None, :]), 0.0)
    ih = np.maximum(np.minimum(ay2[:, None], by2[None, :])
                    - np.maximum(ay1[:, None], by1[None, :]), 0.0)
    inter = iw * ih
    union = (a[:, 2] * a[:, 3])[:, None] + (b[:, 2] * b[:, 3])[None, :] - inter
    return inter / np.maximum(union, 1e-12)


def _np_reference_loss(preds, targets, anchors, *, B, C, object_scale,
                       noobject_scale, class_scale, coord_scale,
                       prior_coord_scale, iou_thresh, seen):
    """Literal (loopy) NumPy port of the PyTorch YOLOV2Loss.forward."""
    preds = np.asarray(preds, np.float64)
    targets = np.asarray(targets, np.float64)
    anchors = np.asarray(anchors, np.float64).reshape(-1, 2)
    batch, _, G, _ = preds.shape

    op = preds.transpose(0, 2, 3, 1).reshape(batch, G, G, B, C + 5)
    sig = lambda v: 1.0 / (1.0 + np.exp(-v))
    tx, ty = sig(op[..., 0]), sig(op[..., 1])
    tw, th = op[..., 2], op[..., 3]
    conf = sig(op[..., 4])
    z = op[..., 5:] - op[..., 5:].max(axis=-1, keepdims=True)
    cls = np.exp(z)
    cls = cls / cls.sum(axis=-1, keepdims=True)
    xywh = np.stack([tx, ty, tw, th], axis=-1)

    coords = np.zeros((batch, G, G, B, 4))
    coords[..., 0] = (tx + np.arange(G)[None, None, :, None]) / G
    coords[..., 1] = (ty + np.arange(G)[None, :, None, None]) / G
    coords[..., 2] = np.exp(tw) * anchors[None, None, None, :, 0] / G
    coords[..., 3] = np.exp(th) * anchors[None, None, None, :, 1] / G

    noobj = np.zeros((batch, G, G, B), bool)
    for b in range(batch):
        ious = []
        for t in range(targets.shape[1]):
            tc = targets[b, t, 1:]
            if tc[0] == 0:
                break
            ious.append(_np_bbox_iou(coords[b].reshape(-1, 4), tc[None]).reshape(G, G, B))
        noobj[b] = np.max(np.stack(ious, -1), -1) <= iou_thresh

    obj = np.zeros((batch, G, G, B), bool)
    obj_iou = np.zeros((batch, G, G, B))
    obj_cls = np.zeros((batch, G, G, B, C))
    t_enc = np.zeros((batch, G, G, B, 4))
    whs = np.zeros((batch, G, G, B, 4))
    for b in range(batch):
        for t in range(targets.shape[1]):
            tcl = int(targets[b, t, 0])
            tc = targets[b, t, 1:]
            if tc[0] == 0:
                break
            i, j = int(tc[0] * G), int(tc[1] * G)
            sh_t = np.zeros((1, 4))
            sh_t[0, 2:] = tc[2:]
            sh_a = np.zeros((B, 4))
            sh_a[:, 2] = anchors[:, 0] / G
            sh_a[:, 3] = anchors[:, 1] / G
            a = int(np.argmax(_np_bbox_iou(sh_a, sh_t)[:, 0]))
            if obj[b, j, i, a]:
                continue
            obj[b, j, i, a] = True
            noobj[b, j, i, a] = False
            obj_iou[b, j, i, a] = _np_bbox_iou(coords[b, j, i, a][None], tc[None])[0, 0]
            obj_cls[b, j, i, a, tcl] = 1.0
            t_enc[b, j, i, a] = [tc[0] * G - i, tc[1] * G - j,
                                 np.log(tc[2] * G / anchors[a, 0]),
                                 np.log(tc[3] * G / anchors[a, 1])]
            whs[b, j, i, a] = 2.0 - tc[2] * tc[3]

    loss_noobj = np.sum(conf[noobj] ** 2)
    loss_obj = np.sum((conf[obj] - obj_iou[obj]) ** 2)
    loss_class = np.sum(((cls - obj_cls)[obj]) ** 2)
    loss_coords = np.sum(((xywh - t_enc)[obj] * whs[obj]) ** 2)
    if seen < 12800:
        prior = np.zeros_like(xywh)
        prior[..., 0] = 0.5
        prior[..., 1] = 0.5
        loss_prior = np.sum(((xywh - prior)[~obj]) ** 2)
    else:
        loss_prior = 0.0
    loss = (class_scale * loss_class + object_scale * loss_obj
            + noobject_scale * loss_noobj + coord_scale * loss_coords
            + prior_coord_scale * loss_prior)
    return loss / batch


if __name__ == "__main__":
    B_anch, C = 5, 20
    batch, G, T = 2, 8, 4

    anchors = jnp.array([[0.57, 0.67], [1.87, 2.06], [3.34, 5.47],
                         [7.88, 3.52], [4.77, 7.17]], dtype=jnp.float32)

    key = jax.random.PRNGKey(0)
    preds = 0.5 * jax.random.normal(key, (batch, B_anch * (C + 5), G, G),
                                    dtype=jnp.float32)

    # targets: (batch, T, 5) = [class, cx, cy, w, h]; a row with x==0 terminates
    targets = jnp.array([
        [[3.0, 0.30, 0.40, 0.20, 0.30],
         [7.0, 0.62, 0.55, 0.10, 0.15],
         [1.0, 0.80, 0.20, 0.35, 0.25],
         [0.0, 0.00, 0.00, 0.00, 0.00]],
        [[12.0, 0.45, 0.70, 0.25, 0.20],
         [5.0, 0.15, 0.25, 0.12, 0.18],
         [0.0, 0.00, 0.00, 0.00, 0.00],
         [0.0, 0.00, 0.00, 0.00, 0.00]],
    ], dtype=jnp.float32)

    loss_fn = jax.jit(functools.partial(
        yolov2_loss, B=B_anch, C=C, object_scale=5.0, noobject_scale=1.0,
        class_scale=1.0, coord_scale=1.0, prior_coord_scale=0.01,
        iou_thresh=0.6, seen=0))
    loss = jax.block_until_ready(loss_fn(preds, targets, anchors))

    ref = _np_reference_loss(np.asarray(preds), np.asarray(targets),
                             np.asarray(anchors), B=B_anch, C=C,
                             object_scale=5.0, noobject_scale=1.0,
                             class_scale=1.0, coord_scale=1.0,
                             prior_coord_scale=0.01, iou_thresh=0.6, seen=0)

    assert jnp.isfinite(loss)
    assert abs(float(loss) - float(ref)) <= 2e-2 * max(1.0, abs(float(ref))), \
        (float(loss), float(ref))
    print("KERNEL_OK")
</pallas_src>

<mosaic_0001>
module attributes {stable_mosaic.version = 11 : i64} {
  func.func @_noobj_prior_kernel(%arg0: i32, %arg1: i32, %arg2: memref<40xf32, #tpu.memory_space<smem>>, %arg3: memref<8xi32, #tpu.memory_space<smem>>, %arg4: memref<1x5x8x128xf32, #tpu.memory_space<vmem>>, %arg5: memref<4x8x128xf32, #tpu.memory_space<vmem>>, %arg6: memref<1x8x128xf32, #tpu.memory_space<vmem>>) attributes {dimension_semantics = [#tpu.dimension_semantics<parallel>, #tpu.dimension_semantics<parallel>], iteration_bounds = array<i64: 2, 1>, scalar_prefetch = 0 : i64, scratch_operands = 0 : i64, tpu.core_type = #tpu.core_type<tc>, window_params = [{transform_indices = @transform_0, window_bounds = array<i64: 40>}, {transform_indices = @transform_1, window_bounds = array<i64: 8>}, {transform_indices = @transform_2, window_bounds = array<i64: 1, 5, 8, 128>}, {transform_indices = @transform_3, window_bounds = array<i64: 4, 8, 128>}, {transform_indices = @transform_4, window_bounds = array<i64: 1, 8, 128>}]} {
    %c0 = arith.constant 0 : index
    %c0_0 = arith.constant 0 : index
    %c0_1 = arith.constant 0 : index
    %0 = vector.load %arg5[%c0, %c0_0, %c0_1] : memref<4x8x128xf32, #tpu.memory_space<vmem>>, vector<1x8x128xf32>
    %1 = vector.shape_cast %0 : vector<1x8x128xf32> to vector<8x128xf32>
    %c1 = arith.constant 1 : index
    %c0_2 = arith.constant 0 : index
    %c0_3 = arith.constant 0 : index
    %2 = vector.load %arg5[%c1, %c0_2, %c0_3] : memref<4x8x128xf32, #tpu.memory_space<vmem>>, vector<1x8x128xf32>
    %3 = vector.shape_cast %2 : vector<1x8x128xf32> to vector<8x128xf32>
    %c2 = arith.constant 2 : index
    %c0_4 = arith.constant 0 : index
    %c0_5 = arith.constant 0 : index
    %4 = vector.load %arg5[%c2, %c0_4, %c0_5] : memref<4x8x128xf32, #tpu.memory_space<vmem>>, vector<1x8x128xf32>
    %5 = vector.shape_cast %4 : vector<1x8x128xf32> to vector<8x128xf32>
    %c3 = arith.constant 3 : index
    %c0_6 = arith.constant 0 : index
    %c0_7 = arith.constant 0 : index
    %6 = vector.load %arg5[%c3, %c0_6, %c0_7] : memref<4x8x128xf32, #tpu.memory_space<vmem>>, vector<1x8x128xf32>
    %7 = vector.shape_cast %6 : vector<1x8x128xf32> to vector<8x128xf32>
    %8 = tpu.iota {dimensions = array<i32: 0>} : vector<8x128xi32>
    %9 = tpu.iota {dimensions = array<i32: 1>} : vector<8x128xi32>
    %c1024_i32 = arith.constant 1024 : i32
    %10 = arith.muli %arg1, %c1024_i32 : i32
    %c128_i32 = arith.constant 128 : i32
    %11 = vector.broadcast %c128_i32 : i32 to vector<8x128xi32>
    %12 = arith.muli %8, %11 : vector<8x128xi32>
    %13 = vector.broadcast %10 : i32 to vector<8x128xi32>
    %14 = arith.addi %13, %12 : vector<8x128xi32>
    %15 = arith.addi %14, %9 : vector<8x128xi32>
    %c320_i32 = arith.constant 320 : i32
    %16 = vector.broadcast %c320_i32 : i32 to vector<8x128xi32>
    %17 = arith.cmpi slt, %15, %16 : vector<8x128xi32>
    %18 = arith.extui %17 : vector<8x128xi1> to vector<8x128xi32>
    %19 = arith.sitofp %18 : vector<8x128xi32> to vector<8x128xf32>
    %cst = arith.constant 0.000000e+00 : f32
    %20 = vector.broadcast %cst : f32 to vector<8x128xf32>
    %c0_i32 = arith.constant 0 : i32
    %c1_i32 = arith.constant 1 : i32
    %21 = arith.muli %arg0, %c1_i32 : i32
    %22 = arith.addi %21, %c0_i32 : i32
    %c5_i32 = arith.constant 5 : i32
    %23 = arith.muli %c0_i32, %c5_i32 : i32
    %c0_i32_8 = arith.constant 0 : i32
    %24 = arith.addi %23, %c0_i32_8 : i32
    %c0_9 = arith.constant 0 : index
    %25 = arith.index_cast %24 : i32 to index
    %c0_10 = arith.constant 0 : index
    %c0_11 = arith.constant 0 : index
    %26 = vector.load %arg4[%c0_9, %25, %c0_10, %c0_11] : memref<1x5x8x128xf32, #tpu.memory_space<vmem>>, vector<1x1x8x128xf32>
    %27 = vector.shape_cast %26 : vector<1x1x8x128xf32> to vector<8x128xf32>
    %28 = arith.negf %27 : vector<8x128xf32>
    %29 = math.exp %28 : vector<8x128xf32>
    %cst_12 = arith.constant 1.000000e+00 : f32
    %30 = vector.broadcast %cst_12 : f32 to vector<8x128xf32>
    %31 = arith.addf %30, %29 : vector<8x128xf32>
    %32 = arith.divf %30, %31 : vector<8x128xf32>
    %c1_i32_13 = arith.constant 1 : i32
    %33 = arith.addi %23, %c1_i32_13 : i32
    %c0_14 = arith.constant 0 : index
    %34 = arith.index_cast %33 : i32 to index
    %c0_15 = arith.constant 0 : index
    %c0_16 = arith.constant 0 : index
    %35 = vector.load %arg4[%c0_14, %34, %c0_15, %c0_16] : memref<1x5x8x128xf32, #tpu.memory_space<vmem>>, vector<1x1x8x128xf32>
    %36 = vector.shape_cast %35 : vector<1x1x8x128xf32> to vector<8x128xf32>
    %37 = arith.negf %36 : vector<8x128xf32>
    %38 = math.exp %37 : vector<8x128xf32>
    %cst_17 = arith.constant 1.000000e+00 : f32
    %39 = vector.broadcast %cst_17 : f32 to vector<8x128xf32>
    %40 = arith.addf %39, %38 : vector<8x128xf32>
    %41 = arith.divf %39, %40 : vector<8x128xf32>
    %c2_i32 = arith.constant 2 : i32
    %42 = arith.addi %23, %c2_i32 : i32
    %c0_18 = arith.constant 0 : index
    %43 = arith.index_cast %42 : i32 to index
    %c0_19 = arith.constant 0 : index
    %c0_20 = arith.constant 0 : index
    %44 = vector.load %arg4[%c0_18, %43, %c0_19, %c0_20] : memref<1x5x8x128xf32, #tpu.memory_space<vmem>>, vector<1x1x8x128xf32>
    %45 = vector.shape_cast %44 : vector<1x1x8x128xf32> to vector<8x128xf32>
    %c3_i32 = arith.constant 3 : i32
    %46 = arith.addi %23, %c3_i32 : i32
    %c0_21 = arith.constant 0 : index
    %47 = arith.index_cast %46 : i32 to index
    %c0_22 = arith.constant 0 : index
    %c0_23 = arith.constant 0 : index
    %48 = vector.load %arg4[%c0_21, %47, %c0_22, %c0_23] : memref<1x5x8x128xf32, #tpu.memory_space<vmem>>, vector<1x1x8x128xf32>
    %49 = vector.shape_cast %48 : vector<1x1x8x128xf32> to vector<8x128xf32>
    %c4_i32 = arith.constant 4 : i32
    %50 = arith.addi %23, %c4_i32 : i32
    %c0_24 = arith.constant 0 : index
    %51 = arith.index_cast %50 : i32 to index
    %c0_25 = arith.constant 0 : index
    %c0_26 = arith.constant 0 : index
    %52 = vector.load %arg4[%c0_24, %51, %c0_25, %c0_26] : memref<1x5x8x128xf32, #tpu.memory_space<vmem>>, vector<1x1x8x128xf32>
    %53 = vector.shape_cast %52 : vector<1x1x8x128xf32> to vector<8x128xf32>
    %54 = arith.negf %53 : vector<8x128xf32>
    %55 = math.exp %54 : vector<8x128xf32>
    %cst_27 = arith.constant 1.000000e+00 : f32
    %56 = vector.broadcast %cst_27 : f32 to vector<8x128xf32>
    %57 = arith.addf %56, %55 : vector<8x128xf32>
    %58 = arith.divf %56, %57 : vector<8x128xf32>
    %59 = arith.addf %32, %1 : vector<8x128xf32>
    %cst_28 = arith.constant 1.250000e-01 : f32
    %60 = vector.broadcast %cst_28 : f32 to vector<8x128xf32>
    %61 = arith.mulf %59, %60 : vector<8x128xf32>
    %62 = arith.addf %41, %3 : vector<8x128xf32>
    %cst_29 = arith.constant 1.250000e-01 : f32
    %63 = vector.broadcast %cst_29 : f32 to vector<8x128xf32>
    %64 = arith.mulf %62, %63 : vector<8x128xf32>
    %65 = math.exp %45 : vector<8x128xf32>
    %66 = arith.mulf %65, %5 : vector<8x128xf32>
    %67 = math.exp %49 : vector<8x128xf32>
    %68 = arith.mulf %67, %7 : vector<8x128xf32>
    %cst_30 = arith.constant 5.000000e-01 : f32
    %69 = vector.broadcast %cst_30 : f32 to vector<8x128xf32>
    %70 = arith.mulf %69, %66 : vector<8x128xf32>
    %71 = arith.subf %61, %70 : vector<8x128xf32>
    %cst_31 = arith.constant 5.000000e-01 : f32
    %72 = vector.broadcast %cst_31 : f32 to vector<8x128xf32>
    %73 = arith.mulf %72, %66 : vector<8x128xf32>
    %74 = arith.addf %61, %73 : vector<8x128xf32>
    %cst_32 = arith.constant 5.000000e-01 : f32
    %75 = vector.broadcast %cst_32 : f32 to vector<8x128xf32>
    %76 = arith.mulf %75, %68 : vector<8x128xf32>
    %77 = arith.subf %64, %76 : vector<8x128xf32>
    %cst_33 = arith.constant 5.000000e-01 : f32
    %78 = vector.broadcast %cst_33 : f32 to vector<8x128xf32>
    %79 = arith.mulf %78, %68 : vector<8x128xf32>
    %80 = arith.addf %64, %79 : vector<8x128xf32>
    %81 = arith.mulf %66, %68 : vector<8x128xf32>
    %cst_34 = arith.constant 6.000000e-01 : f32
    %82 = vector.broadcast %cst_34 : f32 to vector<8x128xf32>
    %83 = arith.mulf %82, %81 : vector<8x128xf32>
    %cst_35 = arith.constant -1.000000e+00 : f32
    %84 = vector.broadcast %cst_35 : f32 to vector<8x128xf32>
    %cst_36 = arith.constant 0.000000e+00 : f32
    %85 = vector.broadcast %cst_36 : f32 to vector<8x128xf32>
    %c4_i32_37 = arith.constant 4 : i32
    %86 = arith.muli %22, %c4_i32_37 : i32
    %c0_i32_38 = arith.constant 0 : i32
    %87 = arith.addi %86, %c0_i32_38 : i32
    %c5_i32_39 = arith.constant 5 : i32
    %88 = arith.muli %87, %c5_i32_39 : i32
    %c0_i32_40 = arith.constant 0 : i32
    %89 = arith.addi %88, %c0_i32_40 : i32
    %90 = arith.index_cast %89 : i32 to index
    %91 = memref.load %arg2[%90] : memref<40xf32, #tpu.memory_space<smem>>
    %c1_i32_41 = arith.constant 1 : i32
    %92 = arith.addi %88, %c1_i32_41 : i32
    %93 = arith.index_cast %92 : i32 to index
    %94 = memref.load %arg2[%93] : memref<40xf32, #tpu.memory_space<smem>>
    %c2_i32_42 = arith.constant 2 : i32
    %95 = arith.addi %88, %c2_i32_42 : i32
    %96 = arith.index_cast %95 : i32 to index
    %97 = memref.load %arg2[%96] : memref<40xf32, #tpu.memory_space<smem>>
    %c3_i32_43 = arith.constant 3 : i32
    %98 = arith.addi %88, %c3_i32_43 : i32
    %99 = arith.index_cast %98 : i32 to index
    %100 = memref.load %arg2[%99] : memref<40xf32, #tpu.memory_space<smem>>
    %c4_i32_44 = arith.constant 4 : i32
    %101 = arith.addi %88, %c4_i32_44 : i32
    %102 = arith.index_cast %101 : i32 to index
    %103 = memref.load %arg2[%102] : memref<40xf32, #tpu.memory_space<smem>>
    %104 = vector.broadcast %97 : f32 to vector<8x128xf32>
    %105 = arith.minimumf %74, %104 : vector<8x128xf32>
    %106 = vector.broadcast %91 : f32 to vector<8x128xf32>
    %107 = arith.maximumf %71, %106 : vector<8x128xf32>
    %108 = arith.subf %105, %107 : vector<8x128xf32>
    %cst_45 = arith.constant 0.000000e+00 : f32
    %109 = vector.broadcast %cst_45 : f32 to vector<8x128xf32>
    %110 = arith.maximumf %108, %109 : vector<8x128xf32>
    %111 = vector.broadcast %100 : f32 to vector<8x128xf32>
    %112 = arith.minimumf %80, %111 : vector<8x128xf32>
    %113 = vector.broadcast %94 : f32 to vector<8x128xf32>
    %114 = arith.maximumf %77, %113 : vector<8x128xf32>
    %115 = arith.subf %112, %114 : vector<8x128xf32>
    %cst_46 = arith.constant 0.000000e+00 : f32
    %116 = vector.broadcast %cst_46 : f32 to vector<8x128xf32>
    %117 = arith.maximumf %115, %116 : vector<8x128xf32>
    %118 = arith.mulf %110, %117 : vector<8x128xf32>
    %cst_47 = arith.constant 1.600000e+00 : f32
    %119 = vector.broadcast %cst_47 : f32 to vector<8x128xf32>
    %120 = arith.mulf %118, %119 : vector<8x128xf32>
    %121 = arith.subf %120, %83 : vector<8x128xf32>
    %122 = vector.broadcast %103 : f32 to vector<8x128xf32>
    %123 = arith.subf %121, %122 : vector<8x128xf32>
    %124 = arith.maximumf %84, %123 : vector<8x128xf32>
    %c4_i32_48 = arith.constant 4 : i32
    %125 = arith.muli %22, %c4_i32_48 : i32
    %c0_i32_49 = arith.constant 0 : i32
    %126 = arith.addi %125, %c0_i32_49 : i32
    %127 = arith.index_cast %126 : i32 to index
    %128 = memref.load %arg3[%127] : memref<8xi32, #tpu.memory_space<smem>>
    %129 = vector.broadcast %128 : i32 to vector<8x128xi32>
    %130 = arith.cmpi eq, %15, %129 : vector<8x128xi32>
    %cst_50 = arith.constant 1.000000e+00 : f32
    %131 = vector.broadcast %cst_50 : f32 to vector<8x128xf32>
    %132 = arith.select %130, %131, %85 : vector<8x128xi1>, vector<8x128xf32>
    %c4_i32_51 = arith.constant 4 : i32
    %133 = arith.muli %22, %c4_i32_51 : i32
    %c1_i32_52 = arith.constant 1 : i32
    %134 = arith.addi %133, %c1_i32_52 : i32
    %c5_i32_53 = arith.constant 5 : i32
    %135 = arith.muli %134, %c5_i32_53 : i32
    %c0_i32_54 = arith.constant 0 : i32
    %136 = arith.addi %135, %c0_i32_54 : i32
    %137 = arith.index_cast %136 : i32 to index
    %138 = memref.load %arg2[%137] : memref<40xf32, #tpu.memory_space<smem>>
    %c1_i32_55 = arith.constant 1 : i32
    %139 = arith.addi %135, %c1_i32_55 : i32
    %140 = arith.index_cast %139 : i32 to index
    %141 = memref.load %arg2[%140] : memref<40xf32, #tpu.memory_space<smem>>
    %c2_i32_56 = arith.constant 2 : i32
    %142 = arith.addi %135, %c2_i32_56 : i32
    %143 = arith.index_cast %142 : i32 to index
    %144 = memref.load %arg2[%143] : memref<40xf32, #tpu.memory_space<smem>>
    %c3_i32_57 = arith.constant 3 : i32
    %145 = arith.addi %135, %c3_i32_57 : i32
    %146 = arith.index_cast %145 : i32 to index
    %147 = memref.load %arg2[%146] : memref<40xf32, #tpu.memory_space<smem>>
    %c4_i32_58 = arith.constant 4 : i32
    %148 = arith.addi %135, %c4_i32_58 : i32
    %149 = arith.index_cast %148 : i32 to index
    %150 = memref.load %arg2[%149] : memref<40xf32, #tpu.memory_space<smem>>
    %151 = vector.broadcast %144 : f32 to vector<8x128xf32>
    %152 = arith.minimumf %74, %151 : vector<8x128xf32>
    %153 = vector.broadcast %138 : f32 to vector<8x128xf32>
    %154 = arith.maximumf %71, %153 : vector<8x128xf32>
    %155 = arith.subf %152, %154 : vector<8x128xf32>
    %cst_59 = arith.constant 0.000000e+00 : f32
    %156 = vector.broadcast %cst_59 : f32 to vector<8x128xf32>
    %157 = arith.maximumf %155, %156 : vector<8x128xf32>
    %158 = vector.broadcast %147 : f32 to vector<8x128xf32>
    %159 = arith.minimumf %80, %158 : vector<8x128xf32>
    %160 = vector.broadcast %141 : f32 to vector<8x128xf32>
    %161 = arith.maximumf %77, %160 : vector<8x128xf32>
    %162 = arith.subf %159, %161 : vector<8x128xf32>
    %cst_60 = arith.constant 0.000000e+00 : f32
    %163 = vector.broadcast %cst_60 : f32 to vector<8x128xf32>
    %164 = arith.maximumf %162, %163 : vector<8x128xf32>
    %165 = arith.mulf %157, %164 : vector<8x128xf32>
    %cst_61 = arith.constant 1.600000e+00 : f32
    %166 = vector.broadcast %cst_61 : f32 to vector<8x128xf32>
    %167 = arith.mulf %165, %166 : vector<8x128xf32>
    %168 = arith.subf %167, %83 : vector<8x128xf32>
    %169 = vector.broadcast %150 : f32 to vector<8x128xf32>
    %170 = arith.subf %168, %169 : vector<8x128xf32>
    %171 = arith.maximumf %124, %170 : vector<8x128xf32>
    %c4_i32_62 = arith.constant 4 : i32
    %172 = arith.muli %22, %c4_i32_62 : i32
    %c1_i32_63 = arith.constant 1 : i32
    %173 = arith.addi %172, %c1_i32_63 : i32
    %174 = arith.index_cast %173 : i32 to index
    %175 = memref.load %arg3[%174] : memref<8xi32, #tpu.memory_space<smem>>
    %176 = vector.broadcast %175 : i32 to vector<8x128xi32>
    %177 = arith.cmpi eq, %15, %176 : vector<8x128xi32>
    %cst_64 = arith.constant 1.000000e+00 : f32
    %178 = vector.broadcast %cst_64 : f32 to vector<8x128xf32>
    %179 = arith.select %177, %178, %132 : vector<8x128xi1>, vector<8x128xf32>
    %c4_i32_65 = arith.constant 4 : i32
    %180 = arith.muli %22, %c4_i32_65 : i32
    %c2_i32_66 = arith.constant 2 : i32
    %181 = arith.addi %180, %c2_i32_66 : i32
    %c5_i32_67 = arith.constant 5 : i32
    %182 = arith.muli %181, %c5_i32_67 : i32
    %c0_i32_68 = arith.constant 0 : i32
    %183 = arith.addi %182, %c0_i32_68 : i32
    %184 = arith.index_cast %183 : i32 to index
    %185 = memref.load %arg2[%184] : memref<40xf32, #tpu.memory_space<smem>>
    %c1_i32_69 = arith.constant 1 : i32
    %186 = arith.addi %182, %c1_i32_69 : i32
    %187 = arith.index_cast %186 : i32 to index
    %188 = memref.load %arg2[%187] : memref<40xf32, #tpu.memory_space<smem>>
    %c2_i32_70 = arith.constant 2 : i32
    %189 = arith.addi %182, %c2_i32_70 : i32
    %190 = arith.index_cast %189 : i32 to index
    %191 = memref.load %arg2[%190] : memref<40xf32, #tpu.memory_space<smem>>
    %c3_i32_71 = arith.constant 3 : i32
    %192 = arith.addi %182, %c3_i32_71 : i32
    %193 = arith.index_cast %192 : i32 to index
    %194 = memref.load %arg2[%193] : memref<40xf32, #tpu.memory_space<smem>>
    %c4_i32_72 = arith.constant 4 : i32
    %195 = arith.addi %182, %c4_i32_72 : i32
    %196 = arith.index_cast %195 : i32 to index
    %197 = memref.load %arg2[%196] : memref<40xf32, #tpu.memory_space<smem>>
    %198 = vector.broadcast %191 : f32 to vector<8x128xf32>
    %199 = arith.minimumf %74, %198 : vector<8x128xf32>
    %200 = vector.broadcast %185 : f32 to vector<8x128xf32>
    %201 = arith.maximumf %71, %200 : vector<8x128xf32>
    %202 = arith.subf %199, %201 : vector<8x128xf32>
    %cst_73 = arith.constant 0.000000e+00 : f32
    %203 = vector.broadcast %cst_73 : f32 to vector<8x128xf32>
    %204 = arith.maximumf %202, %203 : vector<8x128xf32>
    %205 = vector.broadcast %194 : f32 to vector<8x128xf32>
    %206 = arith.minimumf %80, %205 : vector<8x128xf32>
    %207 = vector.broadcast %188 : f32 to vector<8x128xf32>
    %208 = arith.maximumf %77, %207 : vector<8x128xf32>
    %209 = arith.subf %206, %208 : vector<8x128xf32>
    %cst_74 = arith.constant 0.000000e+00 : f32
    %210 = vector.broadcast %cst_74 : f32 to vector<8x128xf32>
    %211 = arith.maximumf %209, %210 : vector<8x128xf32>
    %212 = arith.mulf %204, %211 : vector<8x128xf32>
    %cst_75 = arith.constant 1.600000e+00 : f32
    %213 = vector.broadcast %cst_75 : f32 to vector<8x128xf32>
    %214 = arith.mulf %212, %213 : vector<8x128xf32>
    %215 = arith.subf %214, %83 : vector<8x128xf32>
    %216 = vector.broadcast %197 : f32 to vector<8x128xf32>
    %217 = arith.subf %215, %216 : vector<8x128xf32>
    %218 = arith.maximumf %171, %217 : vector<8x128xf32>
    %c4_i32_76 = arith.constant 4 : i32
    %219 = arith.muli %22, %c4_i32_76 : i32
    %c2_i32_77 = arith.constant 2 : i32
    %220 = arith.addi %219, %c2_i32_77 : i32
    %221 = arith.index_cast %220 : i32 to index
    %222 = memref.load %arg3[%221] : memref<8xi32, #tpu.memory_space<smem>>
    %223 = vector.broadcast %222 : i32 to vector<8x128xi32>
    %224 = arith.cmpi eq, %15, %223 : vector<8x128xi32>
    %cst_78 = arith.constant 1.000000e+00 : f32
    %225 = vector.broadcast %cst_78 : f32 to vector<8x128xf32>
    %226 = arith.select %224, %225, %179 : vector<8x128xi1>, vector<8x128xf32>
    %c4_i32_79 = arith.constant 4 : i32
    %227 = arith.muli %22, %c4_i32_79 : i32
    %c3_i32_80 = arith.constant 3 : i32
    %228 = arith.addi %227, %c3_i32_80 : i32
    %c5_i32_81 = arith.constant 5 : i32
    %229 = arith.muli %228, %c5_i32_81 : i32
    %c0_i32_82 = arith.constant 0 : i32
    %230 = arith.addi %229, %c0_i32_82 : i32
    %231 = arith.index_cast %230 : i32 to index
    %232 = memref.load %arg2[%231] : memref<40xf32, #tpu.memory_space<smem>>
    %c1_i32_83 = arith.constant 1 : i32
    %233 = arith.addi %229, %c1_i32_83 : i32
    %234 = arith.index_cast %233 : i32 to index
    %235 = memref.load %arg2[%234] : memref<40xf32, #tpu.memory_space<smem>>
    %c2_i32_84 = arith.constant 2 : i32
    %236 = arith.addi %229, %c2_i32_84 : i32
    %237 = arith.index_cast %236 : i32 to index
    %238 = memref.load %arg2[%237] : memref<40xf32, #tpu.memory_space<smem>>
    %c3_i32_85 = arith.constant 3 : i32
    %239 = arith.addi %229, %c3_i32_85 : i32
    %240 = arith.index_cast %239 : i32 to index
    %241 = memref.load %arg2[%240] : memref<40xf32, #tpu.memory_space<smem>>
    %c4_i32_86 = arith.constant 4 : i32
    %242 = arith.addi %229, %c4_i32_86 : i32
    %243 = arith.index_cast %242 : i32 to index
    %244 = memref.load %arg2[%243] : memref<40xf32, #tpu.memory_space<smem>>
    %245 = vector.broadcast %238 : f32 to vector<8x128xf32>
    %246 = arith.minimumf %74, %245 : vector<8x128xf32>
    %247 = vector.broadcast %232 : f32 to vector<8x128xf32>
    %248 = arith.maximumf %71, %247 : vector<8x128xf32>
    %249 = arith.subf %246, %248 : vector<8x128xf32>
    %cst_87 = arith.constant 0.000000e+00 : f32
    %250 = vector.broadcast %cst_87 : f32 to vector<8x128xf32>
    %251 = arith.maximumf %249, %250 : vector<8x128xf32>
    %252 = vector.broadcast %241 : f32 to vector<8x128xf32>
    %253 = arith.minimumf %80, %252 : vector<8x128xf32>
    %254 = vector.broadcast %235 : f32 to vector<8x128xf32>
    %255 = arith.maximumf %77, %254 : vector<8x128xf32>
    %256 = arith.subf %253, %255 : vector<8x128xf32>
    %cst_88 = arith.constant 0.000000e+00 : f32
    %257 = vector.broadcast %cst_88 : f32 to vector<8x128xf32>
    %258 = arith.maximumf %256, %257 : vector<8x128xf32>
    %259 = arith.mulf %251, %258 : vector<8x128xf32>
    %cst_89 = arith.constant 1.600000e+00 : f32
    %260 = vector.broadcast %cst_89 : f32 to vector<8x128xf32>
    %261 = arith.mulf %259, %260 : vector<8x128xf32>
    %262 = arith.subf %261, %83 : vector<8x128xf32>
    %263 = vector.broadcast %244 : f32 to vector<8x128xf32>
    %264 = arith.subf %262, %263 : vector<8x128xf32>
    %265 = arith.maximumf %218, %264 : vector<8x128xf32>
    %c4_i32_90 = arith.constant 4 : i32
    %266 = arith.muli %22, %c4_i32_90 : i32
    %c3_i32_91 = arith.constant 3 : i32
    %267 = arith.addi %266, %c3_i32_91 : i32
    %268 = arith.index_cast %267 : i32 to index
    %269 = memref.load %arg3[%268] : memref<8xi32, #tpu.memory_space<smem>>
    %270 = vector.broadcast %269 : i32 to vector<8x128xi32>
    %271 = arith.cmpi eq, %15, %270 : vector<8x128xi32>
    %cst_92 = arith.constant 1.000000e+00 : f32
    %272 = vector.broadcast %cst_92 : f32 to vector<8x128xf32>
    %273 = arith.select %271, %272, %226 : vector<8x128xi1>, vector<8x128xf32>
    %cst_93 = arith.constant 0.000000e+00 : f32
    %274 = vector.broadcast %cst_93 : f32 to vector<8x128xf32>
    %275 = arith.cmpf ole, %265, %274 : vector<8x128xf32>
    %cst_94 = arith.constant 1.000000e+00 : f32
    %cst_95 = arith.constant 0.000000e+00 : f32
    %276 = vector.broadcast %cst_94 : f32 to vector<8x128xf32>
    %277 = vector.broadcast %cst_95 : f32 to vector<8x128xf32>
    %278 = arith.select %275, %276, %277 : vector<8x128xi1>, vector<8x128xf32>
    %cst_96 = arith.constant 1.000000e+00 : f32
    %279 = vector.broadcast %cst_96 : f32 to vector<8x128xf32>
    %280 = arith.subf %279, %273 : vector<8x128xf32>
    %281 = arith.mulf %19, %280 : vector<8x128xf32>
    %282 = arith.mulf %281, %278 : vector<8x128xf32>
    %283 = arith.mulf %282, %58 : vector<8x128xf32>
    %284 = arith.mulf %283, %58 : vector<8x128xf32>
    %285 = arith.addf %20, %284 : vector<8x128xf32>
    %cst_97 = arith.constant 5.000000e-01 : f32
    %286 = vector.broadcast %cst_97 : f32 to vector<8x128xf32>
    %287 = arith.subf %32, %286 : vector<8x128xf32>
    %cst_98 = arith.constant 5.000000e-01 : f32
    %288 = vector.broadcast %cst_98 : f32 to vector<8x128xf32>
    %289 = arith.subf %41, %288 : vector<8x128xf32>
    %290 = arith.mulf %287, %287 : vector<8x128xf32>
    %291 = arith.mulf %289, %289 : vector<8x128xf32>
    %292 = arith.addf %290, %291 : vector<8x128xf32>
    %293 = arith.mulf %45, %45 : vector<8x128xf32>
    %294 = arith.addf %292, %293 : vector<8x128xf32>
    %295 = arith.mulf %49, %49 : vector<8x128xf32>
    %296 = arith.addf %294, %295 : vector<8x128xf32>
    %297 = arith.mulf %281, %296 : vector<8x128xf32>
    %298 = arith.addf %20, %297 : vector<8x128xf32>
    %c1_i32_99 = arith.constant 1 : i32
    %cst_100 = arith.constant dense<0.000000e+00> : vector<128xf32>
    %299 = vector.multi_reduction <add>, %285, %cst_100 [0] : vector<8x128xf32> to vector<128xf32>
    %300 = vector.shape_cast %299 : vector<128xf32> to vector<1x128xf32>
    %c0_101 = arith.constant 0 : index
    %c0_102 = arith.constant 0 : index
    %c0_103 = arith.constant 0 : index
    %301 = vector.load %arg6[%c0_101, %c0_102, %c0_103] : memref<1x8x128xf32, #tpu.memory_space<vmem>>, vector<1x1x128xf32>
    %302 = vector.shape_cast %301 : vector<1x1x128xf32> to vector<1x128xf32>
    %303 = vector.shape_cast %300 : vector<1x128xf32> to vector<1x1x128xf32>
    tpu.vector_store %arg6[%c0_101, %c0_102, %c0_103], %303 {strides = array<i32>} : memref<1x8x128xf32, #tpu.memory_space<vmem>>, vector<1x1x128xf32>,
    %cst_104 = arith.constant dense<0.000000e+00> : vector<128xf32>
    %304 = vector.multi_reduction <add>, %298, %cst_104 [0] : vector<8x128xf32> to vector<128xf32>
    %305 = vector.shape_cast %304 : vector<128xf32> to vector<1x128xf32>
    %c0_105 = arith.constant 0 : index
    %c1_106 = arith.constant 1 : index
    %c0_107 = arith.constant 0 : index
    %306 = vector.load %arg6[%c0_105, %c1_106, %c0_107] : memref<1x8x128xf32, #tpu.memory_space<vmem>>, vector<1x1x128xf32>
    %307 = vector.shape_cast %306 : vector<1x1x128xf32> to vector<1x128xf32>
    %308 = vector.shape_cast %305 : vector<1x128xf32> to vector<1x1x128xf32>
    tpu.vector_store %arg6[%c0_105, %c1_106, %c0_107], %308 {strides = array<i32>} : memref<1x8x128xf32, #tpu.memory_space<vmem>>, vector<1x1x128xf32>,
    %cst_108 = arith.constant 0.000000e+00 : f32
    %309 = vector.broadcast %cst_108 : f32 to vector<6x128xf32>
    %c0_109 = arith.constant 0 : index
    %c2_110 = arith.constant 2 : index
    %c0_111 = arith.constant 0 : index
    %310 = vector.load %arg6[%c0_109, %c2_110, %c0_111] : memref<1x8x128xf32, #tpu.memory_space<vmem>>, vector<1x6x128xf32>
    %311 = vector.shape_cast %310 : vector<1x6x128xf32> to vector<6x128xf32>
    %312 = vector.shape_cast %309 : vector<6x128xf32> to vector<1x6x128xf32>
    tpu.vector_store %arg6[%c0_109, %c2_110, %c0_111], %312 {strides = array<i32>} : memref<1x8x128xf32, #tpu.memory_space<vmem>>, vector<1x6x128xf32>,
    return
  }
  func.func @transform_0(%arg0: i32, %arg1: i32) -> i32 {
    %c0_i32 = arith.constant 0 : i32
    %c0_i32_0 = arith.constant 0 : i32
    return %c0_i32 : i32
  }
  func.func @transform_1(%arg0: i32, %arg1: i32) -> i32 {
    %c0_i32 = arith.constant 0 : i32
    %c0_i32_0 = arith.constant 0 : i32
    return %c0_i32 : i32
  }
  func.func @transform_2(%arg0: i32, %arg1: i32) -> (i32, i32, i32, i32) {
    %c0_i32 = arith.constant 0 : i32
    %c0_i32_0 = arith.constant 0 : i32
    %c0_i32_1 = arith.constant 0 : i32
    return %arg0, %c0_i32, %arg1, %c0_i32_0 : i32, i32, i32, i32
  }
  func.func @transform_3(%arg0: i32, %arg1: i32) -> (i32, i32, i32) {
    %c0_i32 = arith.constant 0 : i32
    %c0_i32_0 = arith.constant 0 : i32
    %c0_i32_1 = arith.constant 0 : i32
    return %c0_i32, %arg1, %c0_i32_0 : i32, i32, i32
  }
  func.func @transform_4(%arg0: i32, %arg1: i32) -> (i32, i32, i32) {
    %c0_i32 = arith.constant 0 : i32
    %c0_i32_0 = arith.constant 0 : i32
    return %arg0, %arg1, %c0_i32 : i32, i32, i32
  }
}

</mosaic_0001>

<bundles_post_ra>
// kernel: yolov2_loss.1
= control target key start
LH: loop header
LB: loop body
LE: loop exit
PB: predicated region body
PF: predicated region fallthrough
CT: control target
= control target key end

     0   :  { %s1059_s0 = inlined_call_operand.vmem [shape: f32[40], index: 0, kind: input, shape index: {}]   ;;  %s1060_s1 = inlined_call_operand.vmem [shape: s32[8], index: 1, kind: input, shape index: {}]   ;;  %s1061_s2 = inlined_call_operand.vmem [shape: f32[2,5,8,128], index: 2, kind: input, shape index: {}]   ;;  %s1062_s3 = inlined_call_operand.vmem [shape: f32[4,8,128], index: 3, kind: input, shape index: {}]   ;;  %s1063_s4 = inlined_call_operand.vmem [shape: f32[2,8,128], index: 4, kind: output, shape index: {}]  }
   0x1   :  { %1067 = sst [smem:[#allocation8_spill]] %s1059_s0 }
   0x2   :  { %1068 = sst [smem:[#allocation9_spill]] %s1060_s1 }
   0x3   :  { %1069 = sst [smem:[#allocation10_spill]] %s1061_s2 }
   0x4   :  { %9 = vsyncpa [#allocation3], 0 }
   0x5   :  { %10 = vsyncpa [#allocation5], 0  ;;  %s797_s15 = smov 0   ;;  %s799_s16 = smov 0  }
   0x6   :  { %s801_s17 = smov 0  }
   0x7 LB: > { %s616_s18 = sadd.s32 4294967295, %s767_s17   ;;  %s28_s19 = sadd.s32 1, %s763_s16  ;;  %s767_s17 = sphi %s801_s17, %s16_s17   ;;  %s763_s16 = sphi %s799_s16, %s1085_s16   ;;  %s759_s15 = sphi %s797_s15, %s1084_s15  }
   0x8   : > { %p30_p0 = scmp.ge.s32.totalorder %s28_s19, 2  ;;  %p618_p1 = scmp.ge.s32.totalorder %s767_s17, 1 }
   0x9   : > { %p157_p2 = scmp.lt.s32.totalorder %s767_s17, 3  ;;  %p822_p4 = scmp.eq.s32.totalorder %s616_s18, 0 }
   0xa   : > { %s1087_s19 = smov (%p30_p0, %s28_s19), 0  ;;  %s1072_s0 = sld [smem:[#allocation8_spill]] }
   0xb   : > { %p818_p3 = pnand %p618_p1, %p157_p2  ;;  %s1073_s1 = sld [smem:[#allocation9_spill]] }
   0xc   : > { %s1071_s21 = scalar_select %p822_p4, 1, 0 }
   0xd   : > { %s1070_s20 = scalar_select %p818_p3, 1, 0 }
   0xe   : > { %p653_p5 = pneg %p818_p3 }
  0x10   : > { %s170_s24 = sshll.u32 %s1072_s0, 4  ;;  %p836_p6 = pnand %p822_p4, %p653_p5  ;;  %s171_s24 = int_to_ptr.vmem [resolvable:$true] %s170_s24 }
  0x11   : > { %s181_s27 = sshll.u32 %s1073_s1, 4  ;;  %s707_s29 = scalar_lea.vmem %s171_s24, 16  ;;  %s182_s27 = int_to_ptr.vmem [resolvable:$true] %s181_s27 }
  0x12   : > { %p708_p7 = scmp.ne.s32.totalorder %s171_s24, %s707_s29  ;;  %p709_p8 = pneg %p836_p6 }
  0x13   : > { %p715_p11 = scmp.lt.s32.totalorder %s171_s24, %s171_s24  ;;  %p716_p12 = scmp.lt.s32.totalorder %s707_s29, %s707_s29 }
  0x14   : > { %p710_p9 = pnand %p709_p8, %p708_p7 }
  0x15   : > { %p717_p13 = por %p716_p12, %p715_p11 }
  0x16   : > { %p711_p10 = pneg %p710_p9 }
  0x18   : > { %p718_p0 = pnand %p717_p13, %p711_p10 }
  0x1a   : > { %721 = shalt.err (!%p718_p0)
}
  0x1b   : > { %s769_s30 = smov [#allocation2]   ;;  %s722_s5 = scalar_lea.vmem %s182_s27, 16 }
  0x1c   : > { %656 = dma.vmem_to_smem (!%p836_p6), %s171_s24, 16, %s769_s30, [#allocation3]  }
  0x1d   : > { %p723_p1 = scmp.ne.s32.totalorder %s182_s27, %s722_s5  ;;  %p730_p4 = scmp.lt.s32.totalorder %s182_s27, %s182_s27 }
  0x1e   : > { %p731_p3 = scmp.lt.s32.totalorder %s722_s5, %s722_s5 }
  0x1f   : > { %p725_p2 = pnand %p723_p1, %p709_p8 }
  0x20   : > { %p732_p7 = por %p731_p3, %p730_p4 }
  0x21   : > { %p726_p5 = pneg %p725_p2 }
  0x23   : > { %p733_p9 = pnand %p732_p7, %p726_p5 }
  0x25   : > { %736 = shalt.err (!%p733_p9)
}
  0x26   : > { %s770_s6 = smov [#allocation4]   ;;  %p1075_p10 = scmp.ne.s32.totalorder %s1070_s20, 0 }
  0x27   : > { %659 = dma.vmem_to_smem (!%p836_p6), %s182_s27, 16, %s770_s6, [#allocation5]  }
  0x28   : > { %212 = sbr.rel (%p1075_p10) target bundleno = 136 (0x88), region = 36  ;;  %p1076_p11 = scmp.ne.s32.totalorder (!%p1075_p10), %s1071_s21, 0 }
  0x2f   : > { %750 = dma.done.wait (%p1076_p11), [#allocation3], 16  }
  0x30   : > { %752 = vsyncadd (%p1076_p11), [#allocation3], 4294967280 }
  0x31   : > { %754 = dma.done.wait (%p1076_p11), [#allocation5], 16  }
  0x32   : > { %756 = vsyncadd (%p1076_p11), [#allocation5], 4294967280 }
  0x33   : > { %222 = sfence }
  0x34   : > { %p252_p3 = scmp.lt.s32.totalorder %s759_s15, 1  ;;  %s1077_s2 = sld [smem:[#allocation10_spill]]  ;;  %v771_v0 = vmov 0.0   ;;  %v278_v1 = vlaneseq  ;;  %v629_v22 = vld [vmem:[%s1062_s3 + $0x10] sm:$0xff]  ;;  %v630_v28 = vld [vmem:[%s1062_s3 + $0x18] sm:$0xff]  ;;  %v271_v35 = vld [vmem:[%s1062_s3] sm:$0xff] }
  0x35   : > { %s873_s20 = smul.u32 20, %s759_s15  ;;  %s879_s21 = sshll.u32 %s759_s15, 2  ;;  %v628_v43 = vld [vmem:[%s1062_s3 + $0x8] sm:$0xff] }
  0x36   : > { %s253_s7 = scalar_select %p252_p3, %s759_s15, 1  ;;  %v279_v8 = vshrl.u32 %v278_v1, 7  ;;  %v281_v11 = vand.u32 127, %v278_v1 }
  0x37   : > { %s337_s22 = sadd.s32 1, %s873_s20  ;;  %s887_s23 = sld [smem:[#allocation4 + %s879_s21]] }
  0x38   : > { %s644_s8 = smul.u32 40, %s253_s7  ;;  %s627_s9 = sshll.u32 %s253_s7, 3  ;;  %v283_v12 = vmul.u32 128, %v279_v8 }
  0x39   : > { %s861_s12 = scalar_lea.vmem %s1063_s4, %s627_s9  ;;  %s368_s24 = sadd.s32 1, %s879_s21 }
  0x3a   : > { %s866_s18 = scalar_lea.vmem %s1077_s2, %s644_s8  ;;  %500 = vst [vmem:[%s861_s12 + $0x2] sm:$0x3f] %v771_v0  ;;  %s892_s15 = sld [smem:[#allocation2 + %s873_s20]]  ;;  %v909_v13 = vadd.s32 %v283_v12, %v281_v11 }
  0x3b   : > { %v290_v2 = vld [vmem:[%s866_s18] sm:$0xff]  ;;  %v633_v3 = vld [vmem:[%s866_s18 + $0x8] sm:$0xff]  ;;  %v876_v6 = vld [vmem:[%s866_s18 + $0x10] sm:$0xff]  ;;  %s894_s25 = smul.u32 5, %s368_s24  ;;  %s401_s26 = sadd.s32 2, %s879_s21 }
  0x3c   : > { %v632_v4 = vmul.f32 -1.442695, %v290_v2  ;;  %v634_v5 = vmul.f32 -1.442695, %v633_v3  ;;  %v882_v7 = vld [vmem:[%s866_s18 + $0x18] sm:$0xff]  ;;  %s897_s27 = sld [smem:[#allocation2 + %s337_s22]]  ;;  %v970_v30 = vmul.f32 %v876_v6, %v876_v6 }
  0x3d   : > { %v321_v9 = vmul.f32 1.442695, %v876_v6  ;;  %v324_v10 = vmul.f32 1.442695, %v882_v7  ;;  %s899_s28 = sld [smem:[#allocation4 + %s368_s24]]  ;;  %s339_s29 = sadd.s32 2, %s873_s20  ;;  %v365_v15 = vstv %s887_s23  ;;  %v991_v38 = vmul.f32 %v882_v7, %v882_v7 }
  0x3e   : > { %691 = vpow2.f32 %v632_v4  ;;  %s341_s30 = sadd.s32 3, %s873_s20  ;;  %s903_s5 = smul.u32 5, %s401_s26  ;;  %v637_v19 = vld [vmem:[%s866_s18 + $0x20] sm:$0xff]  ;;  %vm366_vm0 = vcmp.eq.s32.totalorder %v909_v13, %v365_v15  ;;  %vm287_vm1 = vcmp.lt.s32.totalorder %v909_v13, 320 }
  0x3f   : > { %693 = vpow2.f32 %v634_v5  ;;  %s905_s6 = sld [smem:[#allocation4 + %s401_s26]]  ;;  %s371_s7 = sadd.s32 1, %s894_s25  ;;  %v638_v23 = vmul.f32 -1.442695, %v637_v19  ;;  %v367_v24 = vsel %vm366_vm0, 1.0, %v771_v0  ;;  %v962_v29 = vsel %vm287_vm1, 1.0, %v771_v0 }
  0x40   : > { %695 = vpow2.f32 %v321_v9  ;;  %s373_s8 = sadd.s32 2, %s894_s25  ;;  %s911_s9 = sld [smem:[#allocation2 + %s339_s29]]  ;;  %v347_v32 = vstv %s892_s15 }
  0x41   : > { %697 = vpow2.f32 %v324_v10  ;;  %s375_s10 = sadd.s32 3, %s894_s25  ;;  %s914_s11 = sld [smem:[#allocation2 + %s341_s30]] }
  0x42   : > { %s918_s13 = sld [smem:[#allocation2 + %s894_s25]]  ;;  %s404_s23 = sadd.s32 1, %s903_s5  ;;  %v353_v37 = vstv %s897_s27 }
  0x43   : > { %s920_s14 = sld [smem:[#allocation2 + %s371_s7]]  ;;  %v398_v20 = vstv %s899_s28  ;;  %s406_s29 = sadd.s32 2, %s903_s5 }
  0x44   : > { %s922_s22 = sld [smem:[#allocation2 + %s373_s8]]  ;;  %s408_s30 = sadd.s32 3, %s903_s5  ;;  %vm946_vm2 = vcmp.eq.s32.totalorder %v909_v13, %v398_v20 }
  0x45   : > { %s924_s24 = sld [smem:[#allocation2 + %s375_s10]]  ;;  %s434_s0 = sadd.s32 3, %s879_s21  ;;  %v431_v26 = vstv %s905_s6  ;;  %v400_v33 = vsel %vm946_vm2, 1.0, %v367_v24 }
  0x46   : > { %s927_s26 = sld [smem:[#allocation2 + %s903_s5]]  ;;  %s937_s7 = smul.u32 5, %s434_s0  ;;  %vm976_vm3 = vcmp.eq.s32.totalorder %v909_v13, %v431_v26  ;;  %v345_v39 = vstv %s911_s9 }
  0x47   : > { %s939_s8 = sld [smem:[#allocation4 + %s434_s0]]  ;;  %v351_v40 = vstv %s914_s11  ;;  %v433_v46 = vsel %vm976_vm3, 1.0, %v400_v33  ;;  %s343_s27 = sadd.s32 4, %s873_s20 }
  0x48   : > { %v692_v14 = vpop.eup %691  ;;  %s950_s21 = sld [smem:[#allocation2 + %s404_s23]]  ;;  %s437_s10 = sadd.s32 1, %s937_s7  ;;  %v381_v41 = vstv %s918_s13 }
  0x49   : > { %v694_v16 = vpop.eup %693  ;;  %v294_v17 = vadd.f32 1.0, %v692_v14  ;;  %s952_s28 = sld [smem:[#allocation2 + %s406_s29]]  ;;  %s439_s23 = sadd.s32 2, %s937_s7  ;;  %v387_v45 = vstv %s920_s14 }
  0x4a   : > { %v302_v18 = vadd.f32 1.0, %v694_v16  ;;  %v696_v21 = vpop.eup %695  ;;  %s958_s18 = sld [smem:[#allocation2 + %s408_s30]]  ;;  %s441_s6 = sadd.s32 3, %s937_s7  ;;  %v379_v50 = vstv %s922_s22 }
  0x4b   : > { %699 = vrcp.f32 %v294_v17  ;;  %v698_v27 = vpop.eup %697  ;;  %s965_s2 = sld [smem:[#allocation2 + %s937_s7]]  ;;  %v323_v31 = vmul.f32 %v696_v21, %v629_v22  ;;  %v385_v51 = vstv %s924_s24  ;;  %s377_s9 = sadd.s32 4, %s894_s25 }
  0x4c   : > { %701 = vrcp.f32 %v302_v18  ;;  %s980_s1 = sld [smem:[#allocation2 + %s437_s10]]  ;;  %v326_v36 = vmul.f32 %v698_v27, %v630_v28  ;;  %v414_v52 = vstv %s927_s26  ;;  %s443_s13 = sadd.s32 4, %s937_s7 }
  0x4d   : > { %703 = vpow2.f32 %v638_v23  ;;  %s987_s15 = sld [smem:[#allocation2 + %s439_s23]]  ;;  %v464_v42 = vstv %s939_s8  ;;  %v327_v49 = vmul.f32 0.5, %v323_v31 }
  0x4e   : > { %s996_s0 = sld [smem:[#allocation2 + %s441_s6]]  ;;  %v333_v44 = vmul.f32 %v326_v36, %v323_v31  ;;  %vm1006_vm4 = vcmp.eq.s32.totalorder %v909_v13, %v464_v42  ;;  %v330_v55 = vmul.f32 0.5, %v326_v36  ;;  %v420_v59 = vstv %s950_s21 }
  0x4f   : > { %v412_v56 = vstv %s952_s28  ;;  %v466_v60 = vsel %vm1006_vm4, 1.0, %v433_v46  ;;  %s1026_s11 = sld [smem:[#allocation2 + %s343_s27]] }
  0x50   : > { %v1017_v63 = vmul.f32 0.6, %v333_v44  ;;  %v418_v1 = vstv %s958_s18  ;;  %v469_v10 = vsub.f32 1.0, %v466_v60  ;;  %s1029_s20 = sld [smem:[#allocation2 + %s377_s9]] }
  0x51   : > { %v447_v4 = vstv %s965_s2  ;;  %s410_s2 = sadd.s32 4, %s903_s5  ;;  %s1035_s5 = sld [smem:[#allocation2 + %s443_s13]] }
  0x52   : > { %v453_v5 = vstv %s980_s1  ;;  %s1031_s25 = sld [smem:[#allocation2 + %s410_s2]] }
  0x53   : > { %v445_v9 = vstv %s987_s15 }
  0x54   : > { %v451_v13 = vstv %s996_s0 }
  0x55   : > { %v700_v48 = vpop.eup %699 }
  0x56   : > { %v702_v53 = vpop.eup %701  ;;  %v317_v54 = vadd.f32 %v700_v48, %v271_v35  ;;  %v640_v57 = vadd.f32 -0.5, %v700_v48  ;;  %v394_v60 = vstv %s1029_s20 }
  0x57   : > { %v319_v58 = vadd.f32 %v702_v53, %v628_v43  ;;  %v641_v61 = vadd.f32 -0.5, %v702_v53  ;;  %v704_v15 = vpop.eup %703  ;;  %v470_v53 = vmul.f32 %v962_v29, %v469_v10 }
  0x58   : > { %v318_v62 = vmul.f32 0.125, %v317_v54  ;;  %v477_v2 = vmul.f32 %v640_v57, %v640_v57 }
  0x59   : > { %v320_v3 = vmul.f32 0.125, %v319_v58  ;;  %v478_v6 = vmul.f32 %v641_v61, %v641_v61 }
  0x5a   : > { %v328_v7 = vsub.f32 %v318_v62, %v327_v49  ;;  %v329_v8 = vadd.f32 %v327_v49, %v318_v62 }
  0x5b   : > { %v331_v11 = vsub.f32 %v320_v3, %v330_v55  ;;  %v332_v12 = vadd.f32 %v330_v55, %v320_v3  ;;  %v479_v14 = vadd.f32 %v478_v6, %v477_v2  ;;  %v427_v3 = vstv %s1031_s25 }
  0x5c   : > { %v346_v16 = vmin.f32 %v329_v8, %v345_v39  ;;  %v348_v17 = vmax.f32 %v328_v7, %v347_v32  ;;  %v380_v18 = vmin.f32 %v329_v8, %v379_v50  ;;  %v382_v19 = vmax.f32 %v328_v7, %v381_v41 }
  0x5d   : > { %v352_v20 = vmin.f32 %v332_v12, %v351_v40  ;;  %v354_v21 = vmax.f32 %v331_v11, %v353_v37  ;;  %v386_v22 = vmin.f32 %v332_v12, %v385_v51  ;;  %v388_v23 = vmax.f32 %v331_v11, %v387_v45 }
  0x5e   : > { %v349_v24 = vsub.f32 %v346_v16, %v348_v17  ;;  %v383_v25 = vsub.f32 %v380_v18, %v382_v19  ;;  %v413_v26 = vmin.f32 %v329_v8, %v412_v56  ;;  %v415_v27 = vmax.f32 %v328_v7, %v414_v52 }
  0x5f   : > { %v355_v28 = vsub.f32 %v352_v20, %v354_v21  ;;  %v389_v31 = vsub.f32 %v386_v22, %v388_v23  ;;  %v419_v33 = vmin.f32 %v332_v12, %v418_v1  ;;  %v421_v34 = vmax.f32 %v331_v11, %v420_v59 }
  0x60   : > { %v350_v35 = vmax.f32 %v349_v24, 0.0  ;;  %v384_v32 = vmax.f32 %v383_v25, 0.0  ;;  %v416_v36 = vsub.f32 %v413_v26, %v415_v27  ;;  %v446_v37 = vmin.f32 %v329_v8, %v445_v9 }
  0x61   : > { %v356_v39 = vmax.f32 %v355_v28, 0.0  ;;  %v390_v40 = vmax.f32 %v389_v31, 0.0  ;;  %v422_v41 = vsub.f32 %v419_v33, %v421_v34  ;;  %v448_v42 = vmax.f32 %v328_v7, %v447_v4 }
  0x62   : > { %v417_v43 = vmax.f32 %v416_v36, 0.0  ;;  %v452_v44 = vmin.f32 %v332_v12, %v451_v13  ;;  %v454_v45 = vmax.f32 %v331_v11, %v453_v5  ;;  %v481_v46 = vadd.f32 %v970_v30, %v479_v14 }
  0x63   : > { %v357_v47 = vmul.f32 %v356_v39, %v350_v35  ;;  %v391_v48 = vmul.f32 %v390_v40, %v384_v32  ;;  %v423_v49 = vmax.f32 %v422_v41, 0.0  ;;  %v449_v50 = vsub.f32 %v446_v37, %v448_v42 }
  0x64   : > { %v360_v51 = vstv %s1026_s11  ;;  %v455_v52 = vsub.f32 %v452_v44, %v454_v45  ;;  %v483_v54 = vadd.f32 %v991_v38, %v481_v46  ;;  %v314_v59 = vadd.f32 1.0, %v704_v15 }
  0x65   : > { %v358_v55 = vmul.f32 1.6, %v357_v47  ;;  %v392_v56 = vmul.f32 1.6, %v391_v48  ;;  %v424_v57 = vmul.f32 %v423_v49, %v417_v43  ;;  %v450_v58 = vmax.f32 %v449_v50, 0.0 }
  0x66   : > { %v456_v30 = vmax.f32 %v455_v52, 0.0  ;;  %v484_v61 = vmul.f32 %v483_v54, %v470_v53  ;;  %705 = vrcp.f32 %v314_v59  ;;  %v460_v11 = vstv %s1035_s5 }
  0x67   : > { %v359_v62 = vsub.f32 %v358_v55, %v1017_v63  ;;  %v393_v1 = vsub.f32 %v392_v56, %v1017_v63  ;;  %v425_v2 = vmul.f32 1.6, %v424_v57 }
  0x68   : > { %v457_v4 = vmul.f32 %v456_v30, %v450_v58  ;;  %v493_v5 = vrot.slane %v484_v61, 4 }
  0x69   : > { %v361_v29 = vsub.f32 %v359_v62, %v360_v51  ;;  %v395_v6 = vsub.f32 %v393_v1, %v394_v60  ;;  %v426_v38 = vsub.f32 %v425_v2, %v1017_v63 }
  0x6a   : > { %v458_v7 = vmul.f32 1.6, %v457_v4  ;;  %v494_v8 = vadd.f32 %v493_v5, %v484_v61 }
  0x6b   : > { %v362_v9 = vmax.f32 %v361_v29, -1.0  ;;  %v428_v10 = vsub.f32 %v426_v38, %v427_v3 }
  0x6c   : > { %v459_v12 = vsub.f32 %v458_v7, %v1017_v63  ;;  %v495_v13 = vrot.slane %v494_v8, 2 }
  0x6d   : > { %v396_v14 = vmax.f32 %v362_v9, %v395_v6 }
  0x6e   : > { %v461_v15 = vsub.f32 %v459_v12, %v460_v11  ;;  %v496_v16 = vadd.f32 %v495_v13, %v494_v8 }
  0x6f   : > { %v429_v17 = vmax.f32 %v396_v14, %v428_v10 }
  0x70   : > { %v497_v18 = vrot.slane %v496_v16, 1  ;;  %v706_v21 = vpop.eup %705 }
  0x71   : > { %v462_v19 = vmax.f32 %v429_v17, %v461_v15 }
  0x72   : > { %v498_v20 = vadd.f32 %v497_v18, %v496_v16 }
  0x73   : > { %vm467_vm5 = vcmp.le.f32.partialorder %v462_v19, 0.0 }
  0x74   : > { %v468_v22 = vsel %vm467_vm5, 1.0, %v771_v0  ;;  %499 = vst [vmem:[%s861_s12 + $0x1] sm:$0x1] %v498_v20 }
  0x75   : > { %v471_v23 = vmul.f32 %v470_v53, %v468_v22 }
  0x77   : > { %v472_v24 = vmul.f32 %v706_v21, %v471_v23 }
  0x79   : > { %v473_v25 = vmul.f32 %v706_v21, %v472_v24 }
  0x7b   : > { %v486_v26 = vrot.slane %v473_v25, 4 }
  0x7d   : > { %v487_v27 = vadd.f32 %v486_v26, %v473_v25 }
  0x7f   : > { %v488_v63 = vrot.slane %v487_v27, 2 }
  0x81   : > { %v489_v28 = vadd.f32 %v488_v63, %v487_v27 }
  0x83   : > { %v490_v31 = vrot.slane %v489_v28, 1 }
  0x85   : > { %v491_v33 = vadd.f32 %v490_v31, %v489_v28 }
  0x87   : > { %492 = vst [vmem:[%s861_s12] sm:$0x1] %v491_v33 }
  0x88 PF: > { %s16_s17 = sadd.s32 1, %s767_s17   ;;  %s1084_s15 = smov %s763_s16 }
  0x89   : > { %p13_p4 = scmp.ge.s32.totalorder %s16_s17, 4   ;;  %s1085_s16 = smov %s1087_s19 }
  0x8b   :  { %15 = sbr.rel (!%p13_p4) target bundleno = 7 (0x7), region = 85 }
  0x92   :  { %526 = vsyncpa [#allocation3], 1 }
  0x93   :  { %528 = vsyncpa [#allocation3 + $0x1], 1 }
  0x94   :  { %529 = vsyncpa [#allocation5], 1 }

</bundles_post_ra>
